<compile_context>
chip_gen: v7x
topology: tpu7x:2x2x1
jax: 0.10.0
libtpu: 0.0.40
codegen_flags: <defaults>
</compile_context>

<pallas_src>
import functools

import jax
import jax.numpy as jnp
import numpy as np
from jax.experimental import pallas as pl
from jax.experimental.pallas import tpu as pltpu


# ----------------------------------------------------------------------------
# Pallas kernel: row-wise LayerNorm (PyTorch semantics: unbiased std, eps on std)
# ----------------------------------------------------------------------------
def _layernorm_kernel(x_ref, gb_ref, o_ref, *, eps):
    x = x_ref[...].astype(jnp.float32)                        # (TR, D)
    gb = gb_ref[...]                                          # (2, D) float32
    g = gb[0:1, :]                                            # (1, D)
    b = gb[1:2, :]                                            # (1, D)

    d = x.shape[-1]
    mean = jnp.mean(x, axis=-1, keepdims=True)                # (TR, 1)
    diff = x - mean
    # torch.Tensor.std defaults to the unbiased estimator (divide by D-1).
    var = jnp.sum(diff * diff, axis=-1, keepdims=True) * jnp.float32(1.0 / (d - 1))
    std = jnp.sqrt(var)
    # One reciprocal per ROW (TR, 1) instead of a (TR, D) divide; exact math
    # (approx=False) so numerics match torch's `/ (std + eps)`.
    inv = pl.reciprocal(std + jnp.float32(eps), approx=False)  # (TR, 1)

    o_ref[...] = (diff * inv * g + b).astype(o_ref.dtype)


# ----------------------------------------------------------------------------
# Tiling helpers (generation-aware)
# ----------------------------------------------------------------------------
def _round_up(n, m):
    return ((n + m - 1) // m) * m


def _vmem_capacity_bytes():
    """Per-TensorCore VMEM (128 MiB on v5e/v6e, 64 MiB on v7x)."""
    try:
        cap = getattr(pltpu.get_tpu_info(), "vmem_capacity_bytes", None)
        if cap:
            return int(cap)
    except Exception:
        pass
    return 64 * 1024 * 1024  # conservative fallback (v7x)


def _choose_tile_rows(R, D, io_dtype, *, row_cap=4096):
    """Largest multiple-of-8 row tile whose full footprint fits the VMEM budget.

    Footprint counted per tile-row:
      * 2 input + 2 output double buffers in the I/O dtype, and
      * ~4 f32 full-tile temporaries (x upcast, diff, diff*diff, y).
    Budget = half the chip's per-core VMEM (leaves room for the compiler).
    Also guarantees grid_len >= 2 when R > 16 so both v7x TensorCores are fed.
    """
    vmem_cap = _vmem_capacity_bytes()
    budget = min(vmem_cap // 2, 96 * 1024 * 1024)
    io_bytes = jnp.dtype(io_dtype).itemsize
    per_row = 4 * io_bytes * D + 4 * 4 * D
    max_rows = max(8, budget // per_row)
    tile_rows = max(8, (min(max_rows, row_cap) // 8) * 8)
    # Don't inflate the tile past the actual data.
    tile_rows = min(tile_rows, _round_up(R, 8))
    # Keep at least two grid steps so ("parallel",) can shard across v7x cores.
    if R > 16:
        tile_rows = min(tile_rows, _round_up(pl.cdiv(R, 2), 8))
    return tile_rows


# ----------------------------------------------------------------------------
# pallas_call wrapper
# ----------------------------------------------------------------------------
def layernorm_pallas(x2d, gamma, beta, *, eps=1e-6, tile_rows=None):
    """x2d: (R, D); gamma/beta: (D,). Returns (R, D) with x2d's dtype."""
    R, D = x2d.shape
    assert D > 1, "unbiased std divides by D-1; need D > 1"

    if tile_rows is None:
        tile_rows = _choose_tile_rows(R, D, x2d.dtype)
    grid_len = pl.cdiv(R, tile_rows)

    # Scale/shift packed into a single float32 (2, D) operand: one DMA slot,
    # no bf16 quantization of the affine parameters.
    gb = jnp.stack([gamma, beta], axis=0).astype(jnp.float32)

    vmem_cap = _vmem_capacity_bytes()
    vmem_limit = min((vmem_cap * 3) // 4, 100 * 1024 * 1024)

    kernel = functools.partial(_layernorm_kernel, eps=eps)
    # NOTE: R need not be a multiple of tile_rows.  Pallas pads the last block:
    # out-of-bounds rows read unspecified values (their results are NaN/garbage
    # but stay inside the padded rows) and their output writes are dropped, so
    # no host-side pad/slice (and no extra HBM pass) is needed.
    out = pl.pallas_call(
        kernel,
        out_shape=jax.ShapeDtypeStruct((R, D), x2d.dtype),
        grid_spec=pltpu.PrefetchScalarGridSpec(
            num_scalar_prefetch=0,
            grid=(grid_len,),
            in_specs=[
                pl.BlockSpec((tile_rows, D), lambda i: (i, 0)),
                pl.BlockSpec((2, D), lambda i: (0, 0)),
            ],
            out_specs=pl.BlockSpec((tile_rows, D), lambda i: (i, 0)),
        ),
        compiler_params=pltpu.CompilerParams(
            dimension_semantics=("parallel",),   # megacore-shard the row grid
            vmem_limit_bytes=vmem_limit,
        ),
    )(x2d, gb)
    return out


# ----------------------------------------------------------------------------
# Encoder forward (JAX glue around the Pallas LayerNorm kernel)
# ----------------------------------------------------------------------------
@functools.partial(jax.jit, static_argnames=("num_layers", "eps"))
def encoder_forward(x, gamma, beta, *, num_layers, eps=1e-6):
    """x: (B, S, D). Applies N (abstract) layers then the final LayerNorm."""
    # TODO(synk): the per-layer transform (`layer` passed to Encoder.__init__)
    # is abstract in the provided source; each layer is treated as identity.
    for _ in range(num_layers):
        x = x

    B, S, D = x.shape
    y2d = layernorm_pallas(x.reshape(B * S, D), gamma, beta, eps=eps)
    return y2d.reshape(B, S, D)


# ----------------------------------------------------------------------------
# Pure-JAX reference (mirrors the PyTorch forward exactly)
# ----------------------------------------------------------------------------
def encoder_reference(x, gamma, beta, *, num_layers, eps=1e-6):
    for _ in range(num_layers):
        x = x
    xf = x.astype(jnp.float32)
    mean = jnp.mean(xf, axis=-1, keepdims=True)
    var = jnp.sum((xf - mean) ** 2, axis=-1, keepdims=True) / (x.shape[-1] - 1)
    std = jnp.sqrt(var)
    return (gamma * (xf - mean) / (std + eps) + beta).astype(x.dtype)


if __name__ == "__main__":
    B, S, D = 2, 8, 128       # batch, seq, d_model (lane-dense last dim)
    N_LAYERS = 2

    # Deterministic parameter init exactly as in LayerNorm.__init__:
    gamma = jnp.ones((D,), dtype=jnp.float32)   # a_2
    beta = jnp.zeros((D,), dtype=jnp.float32)   # b_2

    key = jax.random.PRNGKey(0)
    k1, k2, k3 = jax.random.split(key, 3)

    # Case 1: standard shape (R = 16).
    x = jax.random.normal(k1, (B, S, D), dtype=jnp.float32)
    out = jax.block_until_ready(encoder_forward(x, gamma, beta, num_layers=N_LAYERS))
    ref = encoder_reference(x, gamma, beta, num_layers=N_LAYERS)
    np.testing.assert_allclose(np.asarray(out), np.asarray(ref), rtol=1e-5, atol=1e-5)

    # Case 2: ragged row count (R = 21, not a multiple of 8 or of the tile)
    # exercises the partial-last-block path with no host-side pad/slice.
    x2 = jax.random.normal(k2, (3, 7, D), dtype=jnp.float32)
    out2 = jax.block_until_ready(encoder_forward(x2, gamma, beta, num_layers=N_LAYERS))
    ref2 = encoder_reference(x2, gamma, beta, num_layers=N_LAYERS)
    np.testing.assert_allclose(np.asarray(out2), np.asarray(ref2), rtol=1e-5, atol=1e-5)

    # Case 3: bf16 activations (kernel computes in f32, stores bf16).
    x3 = jax.random.normal(k3, (B, S, D), dtype=jnp.float32).astype(jnp.bfloat16)
    out3 = jax.block_until_ready(encoder_forward(x3, gamma, beta, num_layers=N_LAYERS))
    ref3 = encoder_reference(x3, gamma, beta, num_layers=N_LAYERS)
    np.testing.assert_allclose(
        np.asarray(out3.astype(jnp.float32)),
        np.asarray(ref3.astype(jnp.float32)),
        rtol=2e-2, atol=2e-2,
    )

    print("KERNEL_OK")
</pallas_src>

<mosaic_0001>
module attributes {stable_mosaic.version = 11 : i64} {
  func.func @_layernorm_kernel(%arg0: i32, %arg1: memref<16x128xf32, #tpu.memory_space<vmem>>, %arg2: memref<2x128xf32, #tpu.memory_space<vmem>>, %arg3: memref<16x128xf32, #tpu.memory_space<vmem>>) attributes {dimension_semantics = [#tpu.dimension_semantics<parallel>], iteration_bounds = array<i64: 1>, scalar_prefetch = 0 : i64, scratch_operands = 0 : i64, tpu.core_type = #tpu.core_type<tc>, window_params = [{transform_indices = @transform_0, window_bounds = array<i64: 16, 128>}, {pipeline_mode = #tpu.pipeline_mode<synchronous>, transform_indices = @transform_1, window_bounds = array<i64: 2, 128>}, {transform_indices = @transform_2, window_bounds = array<i64: 16, 128>}]} {
    %c0 = arith.constant 0 : index
    %c0_0 = arith.constant 0 : index
    %0 = vector.load %arg1[%c0, %c0_0] : memref<16x128xf32, #tpu.memory_space<vmem>>, vector<16x128xf32>
    %c0_1 = arith.constant 0 : index
    %c0_2 = arith.constant 0 : index
    %1 = vector.load %arg2[%c0_1, %c0_2] : memref<2x128xf32, #tpu.memory_space<vmem>>, vector<2x128xf32>
    %2 = vector.extract_strided_slice %1 {offsets = [0, 0], sizes = [1, 128], strides = [1, 1]} : vector<2x128xf32> to vector<1x128xf32>
    %3 = vector.extract_strided_slice %1 {offsets = [1, 0], sizes = [1, 128], strides = [1, 1]} : vector<2x128xf32> to vector<1x128xf32>
    %cst = arith.constant dense<0.000000e+00> : vector<16xf32>
    %4 = vector.multi_reduction <add>, %0, %cst [1] : vector<16x128xf32> to vector<16xf32>
    %5 = vector.shape_cast %4 : vector<16xf32> to vector<16x1xf32>
    %cst_3 = arith.constant 1.280000e+02 : f32
    %6 = vector.broadcast %cst_3 : f32 to vector<16x1xf32>
    %7 = arith.divf %5, %6 : vector<16x1xf32>
    %8 = vector.broadcast %7 : vector<16x1xf32> to vector<16x128xf32>
    %9 = arith.subf %0, %8 : vector<16x128xf32>
    %10 = arith.mulf %9, %9 : vector<16x128xf32>
    %cst_4 = arith.constant dense<0.000000e+00> : vector<16xf32>
    %11 = vector.multi_reduction <add>, %10, %cst_4 [1] : vector<16x128xf32> to vector<16xf32>
    %12 = vector.shape_cast %11 : vector<16xf32> to vector<16x1xf32>
    %cst_5 = arith.constant 0.00787401571 : f32
    %13 = vector.broadcast %cst_5 : f32 to vector<16x1xf32>
    %14 = arith.mulf %12, %13 : vector<16x1xf32>
    %15 = math.sqrt %14 : vector<16x1xf32>
    %cst_6 = arith.constant 9.99999997E-7 : f32
    %16 = vector.broadcast %cst_6 : f32 to vector<16x1xf32>
    %17 = arith.addf %15, %16 : vector<16x1xf32>
    %18 = tpu.reciprocal %17 : vector<16x1xf32> -> vector<16x1xf32>
    %19 = vector.broadcast %18 : vector<16x1xf32> to vector<16x128xf32>
    %20 = arith.mulf %9, %19 : vector<16x128xf32>
    %21 = vector.broadcast %2 : vector<1x128xf32> to vector<16x128xf32>
    %22 = arith.mulf %20, %21 : vector<16x128xf32>
    %23 = vector.broadcast %3 : vector<1x128xf32> to vector<16x128xf32>
    %24 = arith.addf %22, %23 : vector<16x128xf32>
    %c0_7 = arith.constant 0 : index
    %c0_8 = arith.constant 0 : index
    %25 = vector.load %arg3[%c0_7, %c0_8] : memref<16x128xf32, #tpu.memory_space<vmem>>, vector<16x128xf32>
    tpu.vector_store %arg3[%c0_7, %c0_8], %24 {strides = array<i32>} : memref<16x128xf32, #tpu.memory_space<vmem>>, vector<16x128xf32>,
    return
  }
  func.func @transform_0(%arg0: i32) -> (i32, i32) {
    %c0_i32 = arith.constant 0 : i32
    %c0_i32_0 = arith.constant 0 : i32
    return %arg0, %c0_i32 : i32, i32
  }
  func.func @transform_1(%arg0: i32) -> (i32, i32) {
    %c0_i32 = arith.constant 0 : i32
    %c0_i32_0 = arith.constant 0 : i32
    %c0_i32_1 = arith.constant 0 : i32
    return %c0_i32, %c0_i32_0 : i32, i32
  }
  func.func @transform_2(%arg0: i32) -> (i32, i32) {
    %c0_i32 = arith.constant 0 : i32
    %c0_i32_0 = arith.constant 0 : i32
    return %arg0, %c0_i32 : i32, i32
  }
}

</mosaic_0001>

<bundles_post_ra>
// kernel: encoder_forward.1
= control target key start
LH: loop header
LB: loop body
LE: loop exit
PB: predicated region body
PF: predicated region fallthrough
CT: control target
= control target key end

     0   :  { %7 = vsyncpa [#allocation3], 0  ;;  %s209_s0 = inlined_call_operand.hbm [shape: f32[16,128], index: 0, kind: input, shape index: {}]   ;;  %s210_s1 = inlined_call_operand.vmem [shape: f32[2,128], index: 1, kind: input, shape index: {}]   ;;  %s211_s2 = inlined_call_operand.hbm [shape: f32[16,128], index: 2, kind: output, shape index: {}]  }
   0x1   :  { %8 = vsyncpa [#allocation4], 0  ;;  %s157_s9 = smov [#allocation2]   ;;  %s109_s13 = scalar_lea.hbm %s209_s0, 256 }
   0x2   :  { %s14_s10 = sshll.u32 %s157_s9, 4  ;;  %p110_p0 = scmp.ne.s32.totalorder %s209_s0, %s109_s13  ;;  %s15_s10 = int_to_ptr.vmem [resolvable:$true] %s14_s10 }
   0x3   :  { %p113_p1 = scmp.lt.u32.totalorder %s109_s13, %s209_s0 }
   0x5   :  { %p115_p2 = pnand %p113_p1, %p110_p0 }
   0x7   :  { %118 = shalt.err (!%p115_p2)
}
   0x8   :  { %s119_s18 = scalar_lea.vmem %s15_s10, 256  ;;  %p124_p4 = scmp.lt.s32.totalorder %s15_s10, %s15_s10 }
   0x9   :  { %p120_p3 = scmp.ne.s32.totalorder %s15_s10, %s119_s18  ;;  %p125_p5 = scmp.lt.s32.totalorder %s119_s18, %s119_s18 }
   0xb   :  { %p126_p6 = por %p125_p5, %p124_p4 }
   0xd   :  { %p127_p7 = pnand %p126_p6, %p120_p3 }
   0xf   :  { %130 = shalt.err (!%p127_p7)
}
  0x10   :  { %s158_s19 = smov 128   ;;  %s159_s20 = smov 8  }
  0x11   :  { %20 = dma.hbm_to_vmem [thread:$0]  %s209_s0, 256, %s15_s10, [#allocation3], %s158_s19, %s158_s19, %s159_s20  }
  0x12   :  { %153 = dma.done.wait [#allocation3], 256  }
  0x13   :  { %154 = vsyncadd [#allocation3], 4294967040  ;;  %v26_v0 = vld [vmem:[#allocation2] sm:$0xff]  ;;  %v27_v1 = vld [vmem:[#allocation2 + $0x8] sm:$0xff]  ;;  %v66_v20 = vlaneseq  ;;  %s160_s24 = smov [#allocation5]  }
  0x14   :  { %29 = vadd.xlane.f32.xlu0 %v26_v0  ;;  %v28_v29 = vld [vmem:[%s210_s1] sm:$0x3]  ;;  %s85_s25 = sshll.u32 %s160_s24, 4  ;;  %s86_s25 = int_to_ptr.vmem [resolvable:$true] %s85_s25 }
  0x15   :  { %v67_v26 = vshrl.u32 %v66_v20, 7  ;;  %s131_s26 = scalar_lea.vmem %s86_s25, 256  ;;  %p136_p9 = scmp.lt.s32.totalorder %s86_s25, %s86_s25 }
  0x16   :  { %p132_p8 = scmp.ne.s32.totalorder %s86_s25, %s131_s26  ;;  %p137_p10 = scmp.lt.s32.totalorder %s131_s26, %s131_s26 }
  0x17   :  { %v68_v28 = vsub.s32 0, %v67_v26  ;;  %v74_v30 = vsub.s32 1, %v67_v26 }
  0x18   :  { %31 = vadd.xlane.f32.xlu0 %v27_v1  ;;  %p138_p11 = por %p137_p10, %p136_p9 }
  0x19   :  { %v69_v31 = vrot.slane %v28_v29, %v68_v28  ;;  %v75_v34 = vrot.slane %v28_v29, %v74_v30 }
  0x1a   :  { %p139_p12 = pnand %p138_p11, %p132_p8 }
  0xa1   :  { %v30_v2 = vpop.xlane.xlu0 %29 }
  0xa2   :  { %v34_v3 = vmul.f32 0.0078125, %v30_v2 }
  0xa4   :  { %v36_v4 = vsub.f32 %v26_v0, %v34_v3 }
  0xa5   :  { %v32_v5 = vpop.xlane.xlu0 %31 }
  0xa6   :  { %v35_v6 = vmul.f32 0.0078125, %v32_v5  ;;  %v38_v7 = vmul.f32 %v36_v4, %v36_v4 }
  0xa8   :  { %v37_v8 = vsub.f32 %v27_v1, %v35_v6  ;;  %40 = vadd.xlane.f32.xlu1 %v38_v7 }
  0xaa   :  { %v39_v9 = vmul.f32 %v37_v8, %v37_v8 }
  0xac   :  { %42 = vadd.xlane.f32.xlu1 %v39_v9 }
 0x135   :  { %v41_v10 = vpop.xlane.xlu1 %40 }
 0x136   :  { %v44_v11 = vmul.f32 0.007874016, %v41_v10 }
 0x138   :  { %101 = vrsqrt.f32 %v44_v11  ;;  %vm48_vm0 = vcmp.eq.f32.partialorder %v44_v11, inf  ;;  %v51_v16 = vand.u32 2147483648, %v44_v11  ;;  %vm50_vm1 = vcmp.eq.f32.partialorder %v44_v11, 0.0 }
 0x139   :  { %v43_v12 = vpop.xlane.xlu1 %42 }
 0x13a   :  { %v45_v13 = vmul.f32 0.007874016, %v43_v12 }
 0x13c   :  { %103 = vrsqrt.f32 %v45_v13  ;;  %vm55_vm2 = vcmp.eq.f32.partialorder %v45_v13, inf  ;;  %v58_v23 = vand.u32 2147483648, %v45_v13  ;;  %vm57_vm3 = vcmp.eq.f32.partialorder %v45_v13, 0.0 }
 0x142   :  { %v102_v14 = vpop.eup %101 }
 0x143   :  { %v47_v15 = vmul.f32 %v102_v14, %v44_v11 }
 0x145   :  { %v49_v17 = vsel %vm48_vm0, %v44_v11, %v47_v15 }
 0x146   :  { %v104_v18 = vpop.eup %103  ;;  %v52_v19 = vsel %vm50_vm1, %v51_v16, %v49_v17 }
 0x147   :  { %v54_v21 = vmul.f32 %v104_v18, %v45_v13  ;;  %v60_v22 = vadd.f32 1e-06, %v52_v19 }
 0x149   :  { %v56_v24 = vsel %vm55_vm2, %v45_v13, %v54_v21  ;;  %105 = vrcp.f32 %v60_v22 }
 0x14a   :  { %v59_v25 = vsel %vm57_vm3, %v58_v23, %v56_v24 }
 0x14b   :  { %v61_v27 = vadd.f32 1e-06, %v59_v25 }
 0x14d   :  { %107 = vrcp.f32 %v61_v27 }
 0x153   :  { %v106_v32 = vpop.eup %105 }
 0x154   :  { %v64_v33 = vmul.f32 %v106_v32, %v36_v4 }
 0x156   :  { %v70_v35 = vmul.f32 %v69_v31, %v64_v33 }
 0x157   :  { %v108_v36 = vpop.eup %107 }
 0x158   :  { %v65_v37 = vmul.f32 %v108_v36, %v37_v8  ;;  %v76_v38 = vadd.f32 %v75_v34, %v70_v35 }
 0x15a   :  { %v71_v39 = vmul.f32 %v69_v31, %v65_v37  ;;  %78 = vst [vmem:[#allocation5] sm:$0xff] %v76_v38 }
 0x15c   :  { %v77_v40 = vadd.f32 %v75_v34, %v71_v39 }
 0x15e   :  { %79 = vst [vmem:[#allocation5 + $0x8] sm:$0xff] %v77_v40 }
 0x15f   :  { %142 = shalt.err (!%p139_p12)
}
 0x160   :  { %s143_s28 = scalar_lea.hbm %s211_s2, 256 }
 0x161   :  { %p144_p13 = scmp.ne.s32.totalorder %s211_s2, %s143_s28  ;;  %p147_p0 = scmp.lt.u32.totalorder %s143_s28, %s211_s2 }
 0x163   :  { %p149_p1 = pnand %p147_p0, %p144_p13 }
 0x165   :  { %152 = shalt.err (!%p149_p1)
}
 0x166   :  { %91 = dma.vmem_to_hbm [thread:$0]  %s86_s25, 256, %s211_s2, [#allocation4], %s158_s19, %s158_s19, %s159_s20  }
 0x167   :  { %155 = dma.done.wait [#allocation4], 256  }
 0x168   :  { %156 = vsyncadd [#allocation4], 4294967040 }
 0x169   :  { %95 = vsyncpa [#allocation3], 1 }
 0x16a   :  { %96 = vsyncpa [#allocation4], 1 }

</bundles_post_ra>
